<compile_context>
chip_gen: v7x
topology: tpu7x:2x2x1
jax: 0.10.0
libtpu: 0.0.40
codegen_flags: <defaults>
</compile_context>

<pallas_src>
import functools

import jax
import jax.numpy as jnp
import numpy as np
from jax import lax
from jax.experimental import pallas as pl
from jax.experimental.pallas import tpu as pltpu


_LANE = 128
_TILE_BUDGET = 8 << 20    # target bytes stored per grid step (amortizes ~0.35us/step)
_VALUE_BUDGET = 2 << 20   # max f32 bytes of any single in-kernel intermediate value


def _round_up(n, m):
    return ((n + m - 1) // m) * m


def _lane_tile_candidates(n):
    """Multiples of 128 that divide n, descending (n must be a multiple of 128)."""
    return [d for d in range(n, 0, -_LANE) if n % d == 0]


def _pick_chunk(n, candidates):
    """Largest candidate that divides n; falls back to the full extent."""
    for c in candidates:
        if n % c == 0:
            return c
    return n


# -----------------------------------------------------------------------------
# Prologue: cumulative forget gates fg_cum[b, h, n].
# -----------------------------------------------------------------------------
def _fg_cum_kernel(x_ref, w_ref, b_ref, fg_ref, carry_ref, tril_ref, *,
                   post_log_scale):
    # x_ref: (1, TC, D); w_ref: (D, H_out); b_ref: (1, H_out)
    # fg_ref: (1, TC, H_out); carry_ref: (1, H_out); tril_ref: (TC, TC)
    c = pl.program_id(1)

    @pl.when(c == 0)
    def _():
        carry_ref[...] = jnp.zeros_like(carry_ref)
        tc = tril_ref.shape[0]
        row = lax.broadcasted_iota(jnp.int32, (tc, tc), 0)
        col = lax.broadcasted_iota(jnp.int32, (tc, tc), 1)
        tril_ref[...] = (col <= row).astype(jnp.float32)

    x = x_ref[0]                                                       # (TC, D)
    logits = jnp.dot(x, w_ref[...], preferred_element_type=jnp.float32) + b_ref[...]
    # Stable log-sigmoid: min(x, 0) - log(1 + exp(-|x|)).
    # (log1p would recover a sub-f32-eps correction for very large |x|; kept as
    #  log(1+.) since that term is ~1e-7 absolute, far inside tolerance.)
    fg = (jnp.minimum(logits, 0.0)
          - jnp.log(1.0 + jnp.exp(-jnp.abs(logits)))) * post_log_scale

    # Inclusive cumsum within the chunk via the cached lower-tri matmul.
    fg_cs = jnp.dot(tril_ref[...], fg, preferred_element_type=jnp.float32)
    fg_tot = fg_cs + carry_ref[...]            # add total of all previous chunks
    tc = fg.shape[0]
    carry_ref[...] = fg_tot[tc - 1:tc, :]      # new running total (last row)
    fg_ref[0] = fg_tot


def _compute_fg_cum(x, weight, bias2d, *, post_log_scale):
    """Returns fg_cum with shape (B, H_out, N), N on the lane (last) axis."""
    B, N, D = x.shape
    h_out = weight.shape[1]
    chunk = _pick_chunk(N, (256, 128, 64, 32, 16, 8))
    kernel = functools.partial(_fg_cum_kernel, post_log_scale=post_log_scale)
    fg = pl.pallas_call(
        kernel,
        out_shape=jax.ShapeDtypeStruct((B, N, h_out), jnp.float32),
        grid_spec=pltpu.PrefetchScalarGridSpec(
            num_scalar_prefetch=0,
            grid=(B, N // chunk),
            in_specs=[
                pl.BlockSpec((1, chunk, D), lambda b, c: (b, c, 0)),
                pl.BlockSpec((D, h_out), lambda b, c: (0, 0)),
                pl.BlockSpec((1, h_out), lambda b, c: (0, 0)),
            ],
            out_specs=pl.BlockSpec((1, chunk, h_out), lambda b, c: (b, c, 0)),
            scratch_shapes=[pltpu.VMEM((1, h_out), jnp.float32),
                            pltpu.VMEM((chunk, chunk), jnp.float32)],
        ),
        compiler_params=pltpu.CompilerParams(
            dimension_semantics=("parallel", "arbitrary")),
    )(x, weight, bias2d)
    # One tiny (B, N, H_out) -> (B, H_out, N) transpose in XLA (outside the hot
    # loop) so the main kernel reads lane-contiguous (H, tile) gate slices.
    return jnp.transpose(fg, (0, 2, 1))


# -----------------------------------------------------------------------------
# Main kernels: lane-dense (heads, TI, TJ) outer-difference tiles, computed in
# <=2 MiB row sub-chunks so intermediates never blow up VMEM/vregs.
# -----------------------------------------------------------------------------
def _diff_causal_kernel(fgi_ref, fgj_ref, out_ref, *, sub):
    # fgi_ref: (1, H, TI); fgj_ref: (1, H, TJ); out_ref: (1, H, TI, TJ)
    # The PyTorch module returns the full dense fg_i - fg_j in the causal branch
    # (no tril masking there), so neither do we.
    ti = out_ref.shape[2]
    fg_j = fgj_ref[0]                                           # (H, TJ)

    @pl.loop(0, ti // sub)
    def _(it):
        r = pl.multiple_of(it * sub, sub)
        fg_i = fgi_ref[0, :, pl.ds(r, sub)]                     # (H, sub)
        out_ref[0, :, pl.ds(r, sub), :] = (
            fg_i[:, :, None] - fg_j[:, None, :]).astype(out_ref.dtype)


def _diff_bidir_kernel(ffi_ref, ffj_ref, fri_ref, frj_ref, out_ref, *,
                       ti, tj, sub):
    # ff*: forward gates at the i / j tile; fr*: reversed gates likewise.
    i0 = pl.program_id(1) * ti
    j0 = pl.program_id(2) * tj
    nchunks = ti // sub

    f_j = ffj_ref[0]                                            # (H, TJ)
    r_j = frj_ref[0]                                            # (H, TJ)

    # Tile-level specialization: tiles strictly below / above the diagonal need
    # no masks at all (a single subtract per element).
    below = i0 >= j0 + (tj - 1)     # every element has row >= col -> tril part
    above = j0 >= i0 + (ti - 1)     # every element has col >= row -> triu part

    @pl.when(below)
    def _():
        @pl.loop(0, nchunks)
        def _(it):
            r = pl.multiple_of(it * sub, sub)
            f_i = ffi_ref[0, :, pl.ds(r, sub)]
            out_ref[0, :, pl.ds(r, sub), :] = (
                f_i[:, :, None] - f_j[:, None, :]).astype(out_ref.dtype)

    @pl.when(above)
    def _():
        @pl.loop(0, nchunks)
        def _(it):
            r = pl.multiple_of(it * sub, sub)
            r_i = fri_ref[0, :, pl.ds(r, sub)]
            out_ref[0, :, pl.ds(r, sub), :] = (
                r_j[:, None, :] - r_i[:, :, None]).astype(out_ref.dtype)

    @pl.when(jnp.logical_not(jnp.logical_or(below, above)))
    def _():
        col = j0 + lax.broadcasted_iota(jnp.int32, (sub, tj), 1)

        @pl.loop(0, nchunks)
        def _(it):
            r = pl.multiple_of(it * sub, sub)
            row = (i0 + r) + lax.broadcasted_iota(jnp.int32, (sub, tj), 0)
            f_i = ffi_ref[0, :, pl.ds(r, sub)]
            r_i = fri_ref[0, :, pl.ds(r, sub)]
            d_fwd = f_i[:, :, None] - f_j[:, None, :]           # fg_i  - fg_j
            d_rev = r_j[:, None, :] - r_i[:, :, None]           # rev_j - rev_i
            # On the diagonal both diffs are exactly 0, so one select is exact.
            out_ref[0, :, pl.ds(r, sub), :] = jnp.where(
                (row >= col)[None], d_fwd, d_rev).astype(out_ref.dtype)


def data_dependent_alibi(x, weight, bias, *, heads, causal=True,
                         post_log_scale=1.0, out_dtype=jnp.float32):
    """x: (B, N, D) f32; weight: (D, H_out); bias: (H_out,). Returns (B, heads, N, N).

    out_dtype=jnp.bfloat16 halves the (store-bound) O(N^2) output traffic if the
    consumer tolerates bf16 bias logits; default float32 matches the PyTorch module.
    """
    B, N, D = x.shape
    h_out = heads * (1 if causal else 2)
    assert weight.shape == (D, h_out)
    assert bias.shape == (h_out,)
    bias2d = bias.reshape(1, h_out)
    itemsize = jnp.dtype(out_dtype).itemsize

    # --- prologue: (B, H_out, N) cumulative forget gates ---
    fg_cum = _compute_fg_cum(x, weight, bias2d, post_log_scale=post_log_scale)

    # Pad the sequence axis to a multiple of 128 so every output tile is
    # lane-dense (unmasked vst) and never falls back to a huge full-extent block;
    # padded rows/cols are sliced away at the end.
    Np = _round_up(N, _LANE)
    if Np != N:
        fg_cum = jnp.pad(fg_cum, ((0, 0), (0, 0), (0, Np - N)))

    # --- output tiling: prefer growing TJ (lane axis); scale with heads so the
    # per-step store is ~_TILE_BUDGET bytes; sub-chunk rows so any single in-kernel
    # value stays <= _VALUE_BUDGET f32 bytes (keeps sub a multiple of 128). ---
    cands = _lane_tile_candidates(Np)
    tj = _LANE
    for c in cands:
        if heads * _LANE * c * 4 <= _VALUE_BUDGET:
            tj = c
            break
    ti = _LANE
    for c in cands:
        if heads * c * tj * itemsize <= _TILE_BUDGET:
            ti = c
            break
    sub = _LANE
    for c in _lane_tile_candidates(ti):
        if heads * c * tj * 4 <= _VALUE_BUDGET:
            sub = c
            break

    grid = (B, Np // ti, Np // tj)
    i_spec = pl.BlockSpec((1, heads, ti), lambda b, i, j: (b, 0, i))
    j_spec = pl.BlockSpec((1, heads, tj), lambda b, i, j: (b, 0, j))

    if causal:
        kernel = functools.partial(_diff_causal_kernel, sub=sub)
        in_specs = [i_spec, j_spec]
        operands = (fg_cum, fg_cum)
    else:
        kernel = functools.partial(_diff_bidir_kernel, ti=ti, tj=tj, sub=sub)
        # Split forward / reversed gates outside the kernel (avoids sublane
        # slicing + relayout inside the hot loop when heads % 8 != 0).
        fg_fwd = fg_cum[:, :heads]                       # (B, heads, Np)
        fg_rev = fg_cum[:, heads:]                       # (B, heads, Np)
        in_specs = [i_spec, j_spec, i_spec, j_spec]
        operands = (fg_fwd, fg_fwd, fg_rev, fg_rev)

    # --- VMEM budget: double-buffered output tile + headroom, capped per chip ---
    out_tile_bytes = heads * ti * tj * itemsize
    try:
        vmem_cap = int(pltpu.get_tpu_info().vmem_capacity_bytes)
    except Exception:
        vmem_cap = 64 << 20                              # conservative (v7x-sized)
    vmem_limit = max(32 << 20, 2 * out_tile_bytes + (24 << 20))
    vmem_limit = int(min(vmem_limit, int(vmem_cap * 0.8)))

    out_bytes = B * heads * Np * Np * itemsize
    gate_bytes = (4 * B * (Np // ti) * (Np // tj) * heads * (ti + tj)
                  * (1 if causal else 2))
    cost = pl.CostEstimate(
        flops=(1 if causal else 2) * B * heads * Np * Np,
        transcendentals=0,
        bytes_accessed=out_bytes + gate_bytes,
    )

    out = pl.pallas_call(
        kernel,
        out_shape=jax.ShapeDtypeStruct((B, heads, Np, Np), out_dtype),
        grid_spec=pltpu.PrefetchScalarGridSpec(
            num_scalar_prefetch=0,
            grid=grid,
            in_specs=in_specs,
            out_specs=pl.BlockSpec((1, heads, ti, tj), lambda b, i, j: (b, 0, i, j)),
        ),
        compiler_params=pltpu.CompilerParams(
            dimension_semantics=("parallel", "parallel", "parallel"),
            vmem_limit_bytes=vmem_limit),
        cost_estimate=cost,
    )(*operands)

    if Np != N:
        out = out[:, :, :N, :N]
    return out


def data_dependent_alibi_ref(x, weight, bias, *, heads, causal=True, post_log_scale=1.0):
    """Pure-JAX reference matching the PyTorch forward."""
    fg = jax.nn.log_sigmoid(x @ weight + bias)               # (B, N, H_out)
    fg = jnp.transpose(fg, (0, 2, 1)) * post_log_scale       # (B, H_out, N)
    fg = jnp.cumsum(fg, axis=-1)
    if causal:
        return fg[:, :, :, None] - fg[:, :, None, :]
    f, f_rev = fg[:, :heads], fg[:, heads:]
    d_fwd = f[:, :, :, None] - f[:, :, None, :]
    d_rev = f_rev[:, :, None, :] - f_rev[:, :, :, None]
    n = x.shape[1]
    tril = jnp.tril(jnp.ones((n, n), bool))
    triu = jnp.triu(jnp.ones((n, n), bool))
    return jnp.where(tril, d_fwd, 0.0) + jnp.where(triu, d_rev, 0.0)


if __name__ == "__main__":
    bias_init = 5.0          # nn.init.constant_(linear.bias, 5.0)
    post_log_scale = 1.0

    # --- small shapes consistent with the module (batch=2, seq=8, dim=32, heads=4) ---
    B, N, D, H = 2, 8, 32, 4
    key = jax.random.PRNGKey(0)
    kx, kw = jax.random.split(key)
    x = jax.random.normal(kx, (B, N, D), dtype=jnp.float32)

    # causal=True (module default)
    w = jax.random.uniform(kw, (D, H), jnp.float32,
                           minval=-1.0 / np.sqrt(D), maxval=1.0 / np.sqrt(D))
    b = jnp.full((H,), bias_init, dtype=jnp.float32)
    out = data_dependent_alibi(x, w, b, heads=H, causal=True,
                               post_log_scale=post_log_scale)
    jax.block_until_ready(out)
    ref = data_dependent_alibi_ref(x, w, b, heads=H, causal=True,
                                   post_log_scale=post_log_scale)
    np.testing.assert_allclose(np.asarray(out), np.asarray(ref), atol=1e-5, rtol=1e-5)

    # causal=False (bidirectional)
    w2 = jax.random.uniform(kw, (D, 2 * H), jnp.float32,
                            minval=-1.0 / np.sqrt(D), maxval=1.0 / np.sqrt(D))
    b2 = jnp.full((2 * H,), bias_init, dtype=jnp.float32)
    out2 = data_dependent_alibi(x, w2, b2, heads=H, causal=False,
                                post_log_scale=post_log_scale)
    jax.block_until_ready(out2)
    ref2 = data_dependent_alibi_ref(x, w2, b2, heads=H, causal=False,
                                    post_log_scale=post_log_scale)
    np.testing.assert_allclose(np.asarray(out2), np.asarray(ref2), atol=1e-5, rtol=1e-5)

    # --- larger seq exercising the tiled path: multi-chunk cumsum carry, large
    #     lane-dense tiles, sub-chunked stores, diagonal-band tile specialization ---
    B3, N3, D3, H3 = 1, 1024, 32, 2
    kx3, kw3 = jax.random.split(jax.random.PRNGKey(1))
    x3 = jax.random.normal(kx3, (B3, N3, D3), dtype=jnp.float32)
    w3 = jax.random.uniform(kw3, (D3, 2 * H3), jnp.float32,
                            minval=-1.0 / np.sqrt(D3), maxval=1.0 / np.sqrt(D3))
    b3 = jnp.full((2 * H3,), bias_init, dtype=jnp.float32)
    out3 = data_dependent_alibi(x3, w3, b3, heads=H3, causal=False,
                                post_log_scale=post_log_scale)
    jax.block_until_ready(out3)
    ref3 = data_dependent_alibi_ref(x3, w3, b3, heads=H3, causal=False,
                                    post_log_scale=post_log_scale)
    np.testing.assert_allclose(np.asarray(out3), np.asarray(ref3), atol=2e-4, rtol=2e-4)

    print("KERNEL_OK")
</pallas_src>

<mosaic_0001>
module attributes {stable_mosaic.version = 11 : i64} {
  func.func @_fg_cum_kernel(%arg0: i32, %arg1: i32, %arg2: memref<1x8x32xf32, #tpu.memory_space<vmem>>, %arg3: memref<32x4xf32, #tpu.memory_space<vmem>>, %arg4: memref<1x4xf32, #tpu.memory_space<vmem>>, %arg5: memref<1x8x4xf32, #tpu.memory_space<vmem>>, %arg6: memref<1x4xf32, #tpu.memory_space<vmem>>, %arg7: memref<8x8xf32, #tpu.memory_space<vmem>>) attributes {dimension_semantics = [#tpu.dimension_semantics<parallel>, #tpu.dimension_semantics<arbitrary>], iteration_bounds = array<i64: 2, 1>, scalar_prefetch = 0 : i64, scratch_operands = 2 : i64, tpu.core_type = #tpu.core_type<tc>, window_params = [{transform_indices = @transform_0, window_bounds = array<i64: 1, 8, 32>}, {pipeline_mode = #tpu.pipeline_mode<synchronous>, transform_indices = @transform_1, window_bounds = array<i64: 32, 4>}, {pipeline_mode = #tpu.pipeline_mode<synchronous>, transform_indices = @transform_2, window_bounds = array<i64: 1, 4>}, {transform_indices = @transform_3, window_bounds = array<i64: 1, 8, 4>}]} {
    %c0_i32 = arith.constant 0 : i32
    %0 = arith.cmpi eq, %arg1, %c0_i32 : i32
    %1 = arith.extui %0 : i1 to i32
    %c0_i32_0 = arith.constant 0 : i32
    %2 = arith.cmpi ne, %1, %c0_i32_0 : i32
    scf.if %2 {
      %cst_21 = arith.constant 0.000000e+00 : f32
      %32 = vector.broadcast %cst_21 : f32 to vector<1x4xf32>
      %c0_22 = arith.constant 0 : index
      %c0_23 = arith.constant 0 : index
      %33 = vector.load %arg6[%c0_22, %c0_23] : memref<1x4xf32, #tpu.memory_space<vmem>>, vector<1x4xf32>
      tpu.vector_store %arg6[%c0_22, %c0_23], %32 {strides = array<i32>} : memref<1x4xf32, #tpu.memory_space<vmem>>, vector<1x4xf32>,
      %34 = tpu.iota {dimensions = array<i32: 0>} : vector<8x8xi32>
      %35 = tpu.iota {dimensions = array<i32: 1>} : vector<8x8xi32>
      %36 = arith.cmpi sle, %35, %34 : vector<8x8xi32>
      %37 = arith.extui %36 : vector<8x8xi1> to vector<8x8xi32>
      %38 = arith.sitofp %37 : vector<8x8xi32> to vector<8x8xf32>
      %c0_24 = arith.constant 0 : index
      %c0_25 = arith.constant 0 : index
      %39 = vector.load %arg7[%c0_24, %c0_25] : memref<8x8xf32, #tpu.memory_space<vmem>>, vector<8x8xf32>
      tpu.vector_store %arg7[%c0_24, %c0_25], %38 {strides = array<i32>} : memref<8x8xf32, #tpu.memory_space<vmem>>, vector<8x8xf32>,
    } else {
    }
    %c0 = arith.constant 0 : index
    %c0_1 = arith.constant 0 : index
    %c0_2 = arith.constant 0 : index
    %3 = vector.load %arg2[%c0, %c0_1, %c0_2] : memref<1x8x32xf32, #tpu.memory_space<vmem>>, vector<1x8x32xf32>
    %4 = vector.shape_cast %3 : vector<1x8x32xf32> to vector<8x32xf32>
    %c0_3 = arith.constant 0 : index
    %c0_4 = arith.constant 0 : index
    %5 = vector.load %arg3[%c0_3, %c0_4] : memref<32x4xf32, #tpu.memory_space<vmem>>, vector<32x4xf32>
    %cst = arith.constant dense<0.000000e+00> : vector<8x4xf32>
    %6 = tpu.matmul %4, %5, %cst {dimension_numbers = #tpu.dot_dimension_numbers<[1], [0], [0], [1], [0, 0, 1, 1], [], []>} : vector<8x32xf32>, vector<32x4xf32>, vector<8x4xf32> -> vector<8x4xf32>
    %c0_5 = arith.constant 0 : index
    %c0_6 = arith.constant 0 : index
    %7 = vector.load %arg4[%c0_5, %c0_6] : memref<1x4xf32, #tpu.memory_space<vmem>>, vector<1x4xf32>
    %8 = vector.broadcast %7 : vector<1x4xf32> to vector<8x4xf32>
    %9 = arith.addf %6, %8 : vector<8x4xf32>
    %cst_7 = arith.constant 0.000000e+00 : f32
    %10 = vector.broadcast %cst_7 : f32 to vector<8x4xf32>
    %11 = arith.minimumf %9, %10 : vector<8x4xf32>
    %12 = math.absf %9 : vector<8x4xf32>
    %cst_8 = arith.constant 0.000000e+00 : f32
    %13 = vector.broadcast %cst_8 : f32 to vector<8x4xf32>
    %14 = arith.subf %13, %12 : vector<8x4xf32>
    %15 = math.exp %14 : vector<8x4xf32>
    %cst_9 = arith.constant 1.000000e+00 : f32
    %16 = vector.broadcast %cst_9 : f32 to vector<8x4xf32>
    %17 = arith.addf %16, %15 : vector<8x4xf32>
    %18 = math.log %17 : vector<8x4xf32>
    %19 = arith.subf %11, %18 : vector<8x4xf32>
    %cst_10 = arith.constant 1.000000e+00 : f32
    %20 = vector.broadcast %cst_10 : f32 to vector<8x4xf32>
    %21 = arith.mulf %19, %20 : vector<8x4xf32>
    %c0_11 = arith.constant 0 : index
    %c0_12 = arith.constant 0 : index
    %22 = vector.load %arg7[%c0_11, %c0_12] : memref<8x8xf32, #tpu.memory_space<vmem>>, vector<8x8xf32>
    %cst_13 = arith.constant dense<0.000000e+00> : vector<8x4xf32>
    %23 = tpu.matmul %22, %21, %cst_13 {dimension_numbers = #tpu.dot_dimension_numbers<[1], [0], [0], [1], [0, 0, 1, 1], [], []>} : vector<8x8xf32>, vector<8x4xf32>, vector<8x4xf32> -> vector<8x4xf32>
    %c0_14 = arith.constant 0 : index
    %c0_15 = arith.constant 0 : index
    %24 = vector.load %arg6[%c0_14, %c0_15] : memref<1x4xf32, #tpu.memory_space<vmem>>, vector<1x4xf32>
    %25 = vector.broadcast %24 : vector<1x4xf32> to vector<8x4xf32>
    %26 = arith.addf %23, %25 : vector<8x4xf32>
    %27 = vector.extract_strided_slice %26 {offsets = [7, 0], sizes = [1, 4], strides = [1, 1]} : vector<8x4xf32> to vector<1x4xf32>
    %c0_16 = arith.constant 0 : index
    %c0_17 = arith.constant 0 : index
    %28 = vector.load %arg6[%c0_16, %c0_17] : memref<1x4xf32, #tpu.memory_space<vmem>>, vector<1x4xf32>
    tpu.vector_store %arg6[%c0_16, %c0_17], %27 {strides = array<i32>} : memref<1x4xf32, #tpu.memory_space<vmem>>, vector<1x4xf32>,
    %c0_18 = arith.constant 0 : index
    %c0_19 = arith.constant 0 : index
    %c0_20 = arith.constant 0 : index
    %29 = vector.load %arg5[%c0_18, %c0_19, %c0_20] : memref<1x8x4xf32, #tpu.memory_space<vmem>>, vector<1x8x4xf32>
    %30 = vector.shape_cast %29 : vector<1x8x4xf32> to vector<8x4xf32>
    %31 = vector.shape_cast %26 : vector<8x4xf32> to vector<1x8x4xf32>
    tpu.vector_store %arg5[%c0_18, %c0_19, %c0_20], %31 {strides = array<i32>} : memref<1x8x4xf32, #tpu.memory_space<vmem>>, vector<1x8x4xf32>,
    return
  }
  func.func @transform_0(%arg0: i32, %arg1: i32) -> (i32, i32, i32) {
    %c0_i32 = arith.constant 0 : i32
    %c0_i32_0 = arith.constant 0 : i32
    return %arg0, %arg1, %c0_i32 : i32, i32, i32
  }
  func.func @transform_1(%arg0: i32, %arg1: i32) -> (i32, i32) {
    %c0_i32 = arith.constant 0 : i32
    %c0_i32_0 = arith.constant 0 : i32
    %c0_i32_1 = arith.constant 0 : i32
    return %c0_i32, %c0_i32_0 : i32, i32
  }
  func.func @transform_2(%arg0: i32, %arg1: i32) -> (i32, i32) {
    %c0_i32 = arith.constant 0 : i32
    %c0_i32_0 = arith.constant 0 : i32
    %c0_i32_1 = arith.constant 0 : i32
    return %c0_i32, %c0_i32_0 : i32, i32
  }
  func.func @transform_3(%arg0: i32, %arg1: i32) -> (i32, i32, i32) {
    %c0_i32 = arith.constant 0 : i32
    %c0_i32_0 = arith.constant 0 : i32
    return %arg0, %arg1, %c0_i32 : i32, i32, i32
  }
}

</mosaic_0001>

<bundles_post_ra>
// kernel: tpu_custom_call.1
= control target key start
LH: loop header
LB: loop body
LE: loop exit
PB: predicated region body
PF: predicated region fallthrough
CT: control target
= control target key end

     0   :  { %s588_s12 = smov 0   ;;  %s590_s13 = smov 0   ;;  %s645_s0 = inlined_call_operand.vmem [shape: f32[2,8,32], index: 0, kind: input, shape index: {}]   ;;  %s646_s1 = inlined_call_operand.vmem [shape: f32[32,4], index: 1, kind: input, shape index: {}]   ;;  %s647_s2 = inlined_call_operand.vmem [shape: f32[1,4], index: 2, kind: input, shape index: {}]   ;;  %s648_s3 = inlined_call_operand.vmem [shape: f32[2,8,4], index: 3, kind: output, shape index: {}]  }
   0x1   :  { %s592_s14 = smov 0  }
   0x2 LB: > { %s25_s15 = sadd.s32 1, %s559_s13  ;;  %p471_p0 = scmp.ge.s32.totalorder %s563_s14, 1  ;;  %s563_s14 = sphi %s592_s14, %s13_s14   ;;  %s559_s13 = sphi %s590_s13, %s650_s13   ;;  %s555_s12 = sphi %s588_s12, %s649_s12  }
   0x3   : > { %p27_p1 = scmp.ge.s32.totalorder %s25_s15, 2  ;;  %p155_p2 = scmp.lt.s32.totalorder %s563_s14, 3 }
   0x5   : > { %s652_s15 = smov (%p27_p1, %s25_s15), 0  ;;  %p156_p3 = pnand %p471_p0, %p155_p2 }
   0x6   : > { %v213_v0 = vld [vmem:[%s646_s1] sm:$0xff] (!%p156_p3)  ;;  %v214_v1 = vld [vmem:[%s646_s1 + $0x8] sm:$0xff] (!%p156_p3)  ;;  %v215_v2 = vld [vmem:[%s646_s1 + $0x10] sm:$0xff] (!%p156_p3)  ;;  %v565_v3 = vmov (!%p156_p3), 0.0|0.0   ;;  %vm566_vm0 = vmmov (!%p156_p3), 0   ;;  %v567_v6 = vmov (!%p156_p3), 0.0   ;;  %v203_v9 = vlaneseq (!%p156_p3) }
   0x7   : > { %159 = sbr.rel (%p156_p3) target bundleno = 483 (0x1e3), region = 32  ;;  %504 = vmatprep.subr.bf16.mxu0 (!%p156_p3), %v565_v3  ;;  %v505_v4 = vpack.c.bf16 (!%p156_p3), %v214_v1, %v213_v0  ;;  %v216_v5 = vld [vmem:[%s646_s1 + $0x18] sm:$0xff] (!%p156_p3)  ;;  %496 = vmatprep.mubr.msk.f32.mxu0 (!%p156_p3), %vm566_vm0, %v567_v6  ;;  %p183_p4 = scmp.lt.s32.totalorder (!%p156_p3), %s555_s12, 1  ;;  %vm224_vm1 = vcmask (!%p156_p3), 261120   ;;  %vm210_vm3 = vcmask (!%p156_p3), 64512   ;;  %vm201_vm4 = vcmask (!%p156_p3), 24576  }
   0x8   : > { %499 = vmatprep.subr.mxu1 (!%p156_p3), %v567_v6  ;;  %501 = vmatprep.mubr.msk.f32.mxu1 (!%p156_p3), %vm566_vm0, %v567_v6  ;;  %v508_v7 = vpack.c.bf16 (!%p156_p3), %v216_v5, %v215_v2  ;;  %v204_v10 = vshrl.u32 (!%p156_p3), %v203_v9, 7  ;;  %v206_v11 = vand.u32 (!%p156_p3), 127, %v203_v9  ;;  %202 = vst.msk [vmem:[#allocation2] sm:$0x1] (!%p156_p3), %vm201_vm4, %v567_v6  ;;  %v475_v13 = vld [vmem:[%s647_s2] ss:$0 sm:$0xff] (!%p156_p3) }
   0x9   : > { %506 = vmatpush3.bf16.msra.mxu0 (!%p156_p3), %v505_v4  ;;  %vm389_vm5 = vcmask (!%p156_p3), 31751   ;;  %vm391_vm6 = vcmask (!%p156_p3), 31744  }
   0xa   : > { %507 = vmatprep.subr.bf16.mxu0 (!%p156_p3), %v565_v3  ;;  %vm207_vm2 = vcmp.le.s32.totalorder (!%p156_p3), %v206_v11, %v204_v10 }
   0xb   : > { %v474_v12 = vsel (!%p156_p3), %vm207_vm2, 1.0, %v567_v6 }
   0xc   : > { %211 = vst.msk [vmem:[#allocation3] sm:$0xff] (!%p156_p3), %vm210_vm3, %v474_v12 }
   0xd   : > { %509 = vmatpush3.bf16.msra.mxu0 (!%p156_p3), %v508_v7 }
   0xe   : > { %s654_s12 = smov (!%p183_p4, %s555_s12), 1 }
   0xf   : > { %s472_s24 = sshll.u32 %s654_s12, 3  ;;  %v477_v27 = vld [vmem:[#allocation2] ss:$0 sm:$0xff] }
  0x10   : > { %s189_s27 = scalar_lea.vmem %s645_s0, %s472_s24  ;;  %s196_s5 = scalar_lea.vmem %s648_s3, %s472_s24 }
  0x11   : > { %v212_v8 = vld [vmem:[%s189_s27] sm:$0xff] }
  0x12   : > { %497 = vmatmul.mubr.msk.f32.vlgmr.msra.gmra.mrb[0].mxu0 %vm224_vm1, %v212_v8 }
  0x13   : > { %v307_v26 = vld [vmem:[#allocation3] sm:$0xff] }
  0xe5   : > { %v294_v14 = vpop.f32.mrb[0].mxu0 }
  0xe6   : > { %v295_v15 = vadd.f32 %v475_v13, %v294_v14  ;;  %v498_v16 = vpop.f32.mrb[1].mxu0 }
  0xe8   : > { %v299_v17 = vand.u32 2147483647, %v295_v15  ;;  %v298_v23 = vmin.f32 %v295_v15, 0.0 }
  0xea   : > { %v300_v18 = vsub.f32 0.0, %v299_v17 }
  0xec   : > { %v301_v19 = vmul.f32 1.442695, %v300_v18 }
  0xee   : > { %537 = vpow2.f32 %v301_v19 }
  0xf8   : > { %v538_v20 = vpop.eup %537 }
  0xf9   : > { %v303_v21 = vadd.f32 1.0, %v538_v20 }
  0xfb   : > { %539 = vlog2.f32 %v303_v21 }
 0x105   : > { %v540_v22 = vpop.eup %539 }
 0x106   : > { %v305_v24 = vmul.f32 0.6931472, %v540_v22 }
 0x108   : > { %v306_v25 = vsub.f32 %v298_v23, %v305_v24 }
 0x10a   : > { %500 = vmatpush3.msra.mxu1 %v306_v25 }
 0x10b   : > { %502 = vmatmul.mubr.msk.f32.vlgmr.msra.gmra.mrb[0].mxu1 %vm210_vm3, %v307_v26 }
 0x1de   : > { %v385_v28 = vpop.f32.mrb[0].mxu1 }
 0x1df   : > { %v386_v29 = vadd.f32 %v477_v27, %v385_v28  ;;  %v503_v30 = vpop.f32.mrb[1].mxu1 }
 0x1e1   : > { %390 = vst.msk [vmem:[#allocation2 - $0x7] sm:$0x80] %vm389_vm5, %v386_v29 }
 0x1e2   : > { %392 = vst.msk [vmem:[%s196_s5] sm:$0xff] %vm391_vm6, %v386_v29 }
 0x1e3 PF: > { %s13_s14 = sadd.s32 1, %s563_s14   ;;  %s649_s12 = smov %s559_s13 }
 0x1e4   : > { %p10_p5 = scmp.ge.s32.totalorder %s13_s14, 4   ;;  %s650_s13 = smov %s652_s15 }
 0x1e6   :  { %12 = sbr.rel (!%p10_p5) target bundleno = 2 (0x2), region = 66 }

</bundles_post_ra>
